<compile_context>
chip_gen: v6e
topology: v6e:2x2x1
jax: 0.10.0
libtpu: 0.0.40
codegen_flags: <defaults>
</compile_context>

<pallas_src>
import functools
import math

import jax
import jax.numpy as jnp
from jax import lax
from jax.experimental import pallas as pl
from jax.experimental.pallas import tpu as pltpu


_VMEM_LIMIT_BYTES = 32 << 20        # raise v5e's 16 MiB scoped default; safe on v6e/v7x
_VMEM_TILE_BUDGET = 20 << 20        # target footprint for double-buffered blocks + temps


# ---------------------------------------------------------------------------
# Tiling helpers
# ---------------------------------------------------------------------------
def _round_up(x, m):
    return ((x + m - 1) // m) * m


def _sublane_multiple(itemsize):
    # f32 -> 8, bf16 -> 16, int8 -> 32 (packed-sublane friendly)
    return max(8, 32 // max(int(itemsize), 1))


def _pick_tm(M, d, stream_itemsizes, f32_temp_streams, *,
             vmem_budget_bytes=_VMEM_TILE_BUDGET, min_grid_steps=8):
    """Largest row tile whose double-buffered blocks + f32 temps fit the budget."""
    sub = _sublane_multiple(min(stream_itemsizes))
    per_row = sum(2 * it * d for it in stream_itemsizes) + f32_temp_streams * 4 * d
    tm = max(sub, vmem_budget_bytes // max(per_row, 1))
    # keep enough grid steps for pipelining / megacore sharding when M is large
    tm = min(tm, max(sub, _round_up(-(-M // min_grid_steps), sub)))
    tm = min(tm, _round_up(M, sub))
    return max(sub, (tm // sub) * sub)


# ---------------------------------------------------------------------------
# Kernel 1: LayerNormalization (torch: unbiased std, scalar alpha / bias)
# ---------------------------------------------------------------------------
def _layernorm_kernel(alpha_ref, bias_ref, x_ref, o_ref, *, eps):
    x = x_ref[...].astype(jnp.float32)                   # (tm, d)
    d = x.shape[-1]
    # single-pass moments: one VPU pass + two row reductions
    s = jnp.sum(x, axis=-1, keepdims=True)
    sq = jnp.sum(x * x, axis=-1, keepdims=True)
    mean = s * (1.0 / d)
    # torch .std() is unbiased: divide by (d - 1); clamp tiny negative rounding
    var = jnp.maximum((sq - s * mean) * (1.0 / (d - 1)), 0.0)
    std = jnp.sqrt(var)
    # per-row reciprocal with alpha folded in -> no (tm, d) divide
    inv = alpha_ref[0] / (std + eps)                     # (tm, 1)
    o_ref[...] = ((x - mean) * inv + bias_ref[0]).astype(o_ref.dtype)


# ---------------------------------------------------------------------------
# Kernel 2: fused dropout + residual add (portable counter-based PRNG)
# ---------------------------------------------------------------------------
def _residual_dropout_kernel(seed_ref, x_ref, y_ref, o_ref, *, rate, block_rows, d):
    cdt = o_ref.dtype
    x = x_ref[...].astype(cdt)
    y = y_ref[...].astype(cdt)

    # Counter-based hash of the *global* element index + seed (lowbias32 mixer).
    # Plain int32 ops (iota / xor / mul / logical shift) lower on Mosaic and in
    # interpret mode alike; bit patterns are identical to the uint32 version.
    row0 = pl.program_id(0) * block_rows
    r = lax.broadcasted_iota(jnp.int32, x.shape, 0) + row0
    c = lax.broadcasted_iota(jnp.int32, x.shape, 1)
    h = r * jnp.int32(d) + c + seed_ref[0] * jnp.int32(-1640531527)   # 0x9E3779B9
    h = h ^ lax.shift_right_logical(h, 16)
    h = h * jnp.int32(2145989421)                                     # 0x7FEB352D
    h = h ^ lax.shift_right_logical(h, 15)
    h = h * jnp.int32(-2073057653)                                    # 0x846CA68B
    h = h ^ lax.shift_right_logical(h, 16)

    # top 24 bits -> non-negative int32 in [0, 2^24): signed compare is safe
    r24 = lax.shift_right_logical(h, 8)
    thr = jnp.int32(int(round(rate * float(1 << 24))))
    keep = r24 >= thr                                    # keep prob = 1 - rate

    scale = jnp.asarray(1.0 / (1.0 - rate), cdt)         # inverted-scaling dropout
    o_ref[...] = (x + jnp.where(keep, y * scale, jnp.zeros((), cdt))).astype(o_ref.dtype)


# ---------------------------------------------------------------------------
# Wrappers
# ---------------------------------------------------------------------------
def layer_norm(x, alpha, bias, *, eps=1e-6):
    orig_shape = x.shape
    d = orig_shape[-1]
    M = math.prod(orig_shape[:-1])
    x2 = x.reshape(M, d)
    itemsize = jnp.dtype(x.dtype).itemsize
    tm = _pick_tm(M, d, [itemsize, itemsize], f32_temp_streams=2)
    grid = (pl.cdiv(M, tm),)

    alpha = jnp.asarray(alpha, jnp.float32).reshape(1)
    bias = jnp.asarray(bias, jnp.float32).reshape(1)

    out = pl.pallas_call(
        functools.partial(_layernorm_kernel, eps=float(eps)),
        out_shape=jax.ShapeDtypeStruct((M, d), x.dtype),
        grid_spec=pltpu.PrefetchScalarGridSpec(
            num_scalar_prefetch=0,
            grid=grid,
            in_specs=[
                pl.BlockSpec(memory_space=pltpu.MemorySpace.SMEM),   # alpha (1,)
                pl.BlockSpec(memory_space=pltpu.MemorySpace.SMEM),   # bias  (1,)
                pl.BlockSpec((tm, d), lambda i: (i, 0)),             # x
            ],
            out_specs=pl.BlockSpec((tm, d), lambda i: (i, 0)),
        ),
        compiler_params=pltpu.CompilerParams(
            dimension_semantics=("parallel",),
            vmem_limit_bytes=_VMEM_LIMIT_BYTES,
        ),
        cost_estimate=pl.CostEstimate(
            flops=6 * M * d,
            transcendentals=M,
            bytes_accessed=2 * M * d * itemsize,
        ),
    )(alpha, bias, x2)
    return out.reshape(orig_shape)


def residual_add_dropout(x, y, *, rate=0.0, seed=0):
    assert x.shape == y.shape
    rate = float(rate)
    out_dtype = jnp.result_type(x.dtype, y.dtype)
    if rate <= 0.0:
        # eval / p=0: bare add — let XLA fuse into the sublayer's epilogue
        return x.astype(out_dtype) + y.astype(out_dtype)
    if rate >= 1.0:
        # torch Dropout(p=1) zeroes everything -> out == x
        return x.astype(out_dtype)

    orig_shape = x.shape
    d = orig_shape[-1]
    M = math.prod(orig_shape[:-1])
    x2 = x.reshape(M, d)
    y2 = y.reshape(M, d)                      # native dtype; cast happens in-register
    itemsizes = [jnp.dtype(x.dtype).itemsize,
                 jnp.dtype(y.dtype).itemsize,
                 jnp.dtype(out_dtype).itemsize]
    tm = _pick_tm(M, d, itemsizes, f32_temp_streams=3)
    grid = (pl.cdiv(M, tm),)
    seed_arr = jnp.asarray([seed], jnp.int32)

    out = pl.pallas_call(
        functools.partial(_residual_dropout_kernel, rate=rate, block_rows=tm, d=d),
        out_shape=jax.ShapeDtypeStruct((M, d), out_dtype),
        grid_spec=pltpu.PrefetchScalarGridSpec(
            num_scalar_prefetch=0,
            grid=grid,
            in_specs=[
                pl.BlockSpec(memory_space=pltpu.MemorySpace.SMEM),   # seed (1,)
                pl.BlockSpec((tm, d), lambda i: (i, 0)),             # x
                pl.BlockSpec((tm, d), lambda i: (i, 0)),             # sublayer out
            ],
            out_specs=pl.BlockSpec((tm, d), lambda i: (i, 0)),
        ),
        compiler_params=pltpu.CompilerParams(
            dimension_semantics=("parallel",),
            vmem_limit_bytes=_VMEM_LIMIT_BYTES,
        ),
        cost_estimate=pl.CostEstimate(
            flops=14 * M * d,          # hash mixer + select + scale + add
            transcendentals=0,
            bytes_accessed=sum(it * M * d for it in itemsizes),
        ),
    )(seed_arr, x2, y2)
    return out.reshape(orig_shape)


def residual_connection(x, sublayer, alpha=1.0, bias=0.0, *, dropout_rate=0.0,
                        eps=1e-6, use_norm=True, training=True, seed=0):
    """out = x + dropout(sublayer(norm(x)))  (or sublayer(x) if use_norm=False)."""
    # TODO(synk): the sublayer is an arbitrary user callable, so it runs as
    # ordinary JAX between the two Pallas kernels instead of being fused.
    sub_in = layer_norm(x, alpha, bias, eps=eps) if use_norm else x
    y = sublayer(sub_in)
    rate = float(dropout_rate) if training else 0.0
    return residual_add_dropout(x, y, rate=rate, seed=seed)


# ---------------------------------------------------------------------------
if __name__ == "__main__":
    batch, seq, d_model = 2, 8, 128        # d_model multiple of 128: lane-dense stores
    eps = 1e-6

    key = jax.random.PRNGKey(0)
    kx, kw = jax.random.split(key, 2)
    x = jax.random.normal(kx, (batch, seq, d_model), jnp.float32)
    w_sub = jax.random.normal(kw, (d_model, d_model), jnp.float32) / math.sqrt(d_model)
    sublayer = lambda z: jnp.tanh(z @ w_sub)      # stand-in for attention / FFN

    alpha = jnp.array([1.25], jnp.float32)
    bias = jnp.array([-0.1], jnp.float32)

    # pure-JAX reference of the torch LayerNormalization (unbiased std)
    def ref_norm(z):
        mean = jnp.mean(z, axis=-1, keepdims=True)
        var = jnp.sum((z - mean) ** 2, axis=-1, keepdims=True) / (z.shape[-1] - 1)
        std = jnp.sqrt(var)
        return alpha[0] * (z - mean) / (std + eps) + bias[0]

    # 1) eval mode (dropout inactive): out == x + sublayer(norm(x))
    out_eval = residual_connection(x, sublayer, alpha, bias,
                                   dropout_rate=0.1, training=False, eps=eps)
    out_eval = jax.block_until_ready(out_eval)
    ref_eval = x + sublayer(ref_norm(x))
    assert out_eval.shape == x.shape
    assert jnp.allclose(out_eval, ref_eval, atol=1e-4, rtol=1e-4)

    # 2) use_norm=False path: out == x + sublayer(x)
    out_nonorm = residual_connection(x, sublayer, alpha, bias,
                                     dropout_rate=0.0, training=True,
                                     use_norm=False, eps=eps)
    out_nonorm = jax.block_until_ready(out_nonorm)
    assert jnp.allclose(out_nonorm, x + sublayer(x), atol=1e-4, rtol=1e-4)

    # 3) training mode with dropout: each element of (out - x) must be either
    #    ~0 (dropped) or ~sublayer(norm(x)) / (1 - p) (kept, inverted scaling).
    p = 0.5
    out_train = residual_connection(x, sublayer, alpha, bias,
                                    dropout_rate=p, training=True,
                                    eps=eps, seed=1234)
    out_train = jax.block_until_ready(out_train)
    delta = out_train - x
    kept_val = sublayer(ref_norm(x)) / (1.0 - p)
    dropped = jnp.abs(delta) <= 1e-5
    kept = jnp.abs(delta - kept_val) <= 1e-3
    assert bool(jnp.all(dropped | kept))
    assert bool(jnp.any(dropped)) and bool(jnp.any(kept))

    print("KERNEL_OK")
</pallas_src>

<mosaic_0001>
module attributes {stable_mosaic.version = 11 : i64} {
  func.func @_layernorm_kernel(%arg0: i32, %arg1: memref<1xf32, #tpu.memory_space<smem>>, %arg2: memref<1xf32, #tpu.memory_space<smem>>, %arg3: memref<8x128xf32, #tpu.memory_space<vmem>>, %arg4: memref<8x128xf32, #tpu.memory_space<vmem>>) attributes {dimension_semantics = [#tpu.dimension_semantics<parallel>], iteration_bounds = array<i64: 2>, scalar_prefetch = 0 : i64, scratch_operands = 0 : i64, tpu.core_type = #tpu.core_type<tc>, window_params = [{transform_indices = @transform_0, window_bounds = array<i64: 1>}, {transform_indices = @transform_1, window_bounds = array<i64: 1>}, {transform_indices = @transform_2, window_bounds = array<i64: 8, 128>}, {transform_indices = @transform_3, window_bounds = array<i64: 8, 128>}]} {
    %c0 = arith.constant 0 : index
    %c0_0 = arith.constant 0 : index
    %0 = vector.load %arg3[%c0, %c0_0] : memref<8x128xf32, #tpu.memory_space<vmem>>, vector<8x128xf32>
    %cst = arith.constant dense<0.000000e+00> : vector<8xf32>
    %1 = vector.multi_reduction <add>, %0, %cst [1] : vector<8x128xf32> to vector<8xf32>
    %2 = vector.shape_cast %1 : vector<8xf32> to vector<8x1xf32>
    %3 = arith.mulf %0, %0 : vector<8x128xf32>
    %cst_1 = arith.constant dense<0.000000e+00> : vector<8xf32>
    %4 = vector.multi_reduction <add>, %3, %cst_1 [1] : vector<8x128xf32> to vector<8xf32>
    %5 = vector.shape_cast %4 : vector<8xf32> to vector<8x1xf32>
    %cst_2 = arith.constant 7.812500e-03 : f32
    %6 = vector.broadcast %cst_2 : f32 to vector<8x1xf32>
    %7 = arith.mulf %2, %6 : vector<8x1xf32>
    %8 = arith.mulf %2, %7 : vector<8x1xf32>
    %9 = arith.subf %5, %8 : vector<8x1xf32>
    %cst_3 = arith.constant 0.00787401571 : f32
    %10 = vector.broadcast %cst_3 : f32 to vector<8x1xf32>
    %11 = arith.mulf %9, %10 : vector<8x1xf32>
    %cst_4 = arith.constant 0.000000e+00 : f32
    %12 = vector.broadcast %cst_4 : f32 to vector<8x1xf32>
    %13 = arith.maximumf %11, %12 : vector<8x1xf32>
    %14 = math.sqrt %13 : vector<8x1xf32>
    %c0_5 = arith.constant 0 : index
    %15 = memref.load %arg1[%c0_5] : memref<1xf32, #tpu.memory_space<smem>>
    %cst_6 = arith.constant 9.99999997E-7 : f32
    %16 = vector.broadcast %cst_6 : f32 to vector<8x1xf32>
    %17 = arith.addf %14, %16 : vector<8x1xf32>
    %18 = vector.broadcast %15 : f32 to vector<8x1xf32>
    %19 = arith.divf %18, %17 : vector<8x1xf32>
    %20 = vector.broadcast %7 : vector<8x1xf32> to vector<8x128xf32>
    %21 = arith.subf %0, %20 : vector<8x128xf32>
    %22 = vector.broadcast %19 : vector<8x1xf32> to vector<8x128xf32>
    %23 = arith.mulf %21, %22 : vector<8x128xf32>
    %c0_7 = arith.constant 0 : index
    %24 = memref.load %arg2[%c0_7] : memref<1xf32, #tpu.memory_space<smem>>
    %25 = vector.broadcast %24 : f32 to vector<8x128xf32>
    %26 = arith.addf %23, %25 : vector<8x128xf32>
    %c0_8 = arith.constant 0 : index
    %c0_9 = arith.constant 0 : index
    %27 = vector.load %arg4[%c0_8, %c0_9] : memref<8x128xf32, #tpu.memory_space<vmem>>, vector<8x128xf32>
    tpu.vector_store %arg4[%c0_8, %c0_9], %26 {strides = array<i32>} : memref<8x128xf32, #tpu.memory_space<vmem>>, vector<8x128xf32>,
    return
  }
  func.func @transform_0(%arg0: i32) -> i32 {
    %c0_i32 = arith.constant 0 : i32
    %c0_i32_0 = arith.constant 0 : i32
    return %c0_i32 : i32
  }
  func.func @transform_1(%arg0: i32) -> i32 {
    %c0_i32 = arith.constant 0 : i32
    %c0_i32_0 = arith.constant 0 : i32
    return %c0_i32 : i32
  }
  func.func @transform_2(%arg0: i32) -> (i32, i32) {
    %c0_i32 = arith.constant 0 : i32
    %c0_i32_0 = arith.constant 0 : i32
    return %arg0, %c0_i32 : i32, i32
  }
  func.func @transform_3(%arg0: i32) -> (i32, i32) {
    %c0_i32 = arith.constant 0 : i32
    %c0_i32_0 = arith.constant 0 : i32
    return %arg0, %c0_i32 : i32, i32
  }
}

</mosaic_0001>

<bundles_post_ra>
// kernel: tpu_custom_call.1
= control target key start
LH: loop header
LB: loop body
LE: loop exit
PB: predicated region body
PF: predicated region fallthrough
CT: control target
= control target key end

     0   :  { %s630_s0 = inlined_call_operand.<no memory space> [shape: f32[1], index: 0, kind: input, shape index: {}]   ;;  %s631_s1 = inlined_call_operand.<no memory space> [shape: f32[1], index: 1, kind: input, shape index: {}]   ;;  %s632_s2 = inlined_call_operand.hbm [shape: f32[16,128], index: 2, kind: input, shape index: {}]   ;;  %s633_s3 = inlined_call_operand.hbm [shape: f32[16,128], index: 3, kind: output, shape index: {}]  }
   0x1   :  { %8 = sst [smem:[#allocation2]] %s630_s0 }
   0x2   :  { %9 = sst [smem:[#allocation3]] %s631_s1 }
   0x3   :  { %10 = vsyncpa [#allocation5], 0 }
   0x4   :  { %12 = vsyncpa [#allocation5 + $0x1], 0 }
   0x5   :  { %13 = vsyncpa [#allocation6], 0 }
   0x6   :  { %15 = vsyncpa [#allocation6 + $0x1], 0  ;;  %s485_s16 = smov 0   ;;  %s487_s17 = smov 0  }
   0x7   :  { %s489_s18 = smov 0   ;;  %s491_s19 = smov 0  }
   0x8 LB: > { %s506_s0 = sadd.s32 4294967295, %s455_s19   ;;  %s301_s1 = sadd.s32 4294967294, %s455_s19   ;;  %s455_s19 = sphi %s491_s19, %s650_s19   ;;  %s451_s18 = sphi %s489_s18, %s649_s18   ;;  %s447_s17 = sphi %s487_s17, %s648_s17   ;;  %s443_s16 = sphi %s485_s16, %s647_s16  }
   0x9   : > { %s510_s20 = sadd.s32 1, %s455_s19   ;;  %s70_s21 = sadd.s32 1, %s451_s18 }
   0xa   : > { %s67_s22 = ssub.s32 %s455_s19, %s510_s20  ;;  %p77_p0 = scmp.ne.s32.totalorder %s451_s18, %s447_s17 }
   0xb   : > { %p68_p1 = scmp.eq.s32.totalorder %s67_s22, 0  ;;  %p78_p2 = scmp.eq.s32.totalorder %s455_s19, 0 }
   0xc   : > { %p83_p3 = scmp.ne.s32.totalorder %s447_s17, %s443_s16  ;;  %p84_p4 = scmp.eq.s32.totalorder %s506_s0, 0 }
   0xd   : > { %s522_s23 = scalar_select %p68_p1, %s451_s18, %s70_s21  }
   0xe   : > { %p524_p5 = por %p78_p2, %p77_p0  ;;  %p528_p6 = por %p84_p4, %p83_p3 }
   0xf   : > { %p107_p7 = scmp.eq.s32.totalorder %s506_s0, 1  ;;  %p113_p8 = scmp.eq.s32.totalorder %s301_s1, 1 }
  0x10   : > { %s637_s25 = scalar_select %p528_p6, 1, 0 }
  0x11   : > { %p325_p10 = scmp.lt.s32.totalorder %s455_s19, 2  ;;  %p535_p11 = por %p107_p7, %p77_p0 }
  0x12   : > { %p539_p12 = por %p113_p8, %p83_p3  ;;  %s139_s28 = sand.u32 1, %s451_s18  }
  0x13   : > { %s638_s26 = scalar_select %p535_p11, 1, 0 }
  0x14   : > { %s639_s27 = scalar_select %p539_p12, 1, 0 }
  0x15   : > { %s305_s29 = sshll.u32 %s455_s19, 7  ;;  %s304_s30 = sshll.u32 %s139_s28, 3 }
  0x16   : > { %s548_s6 = scalar_lea.hbm %s632_s2, %s305_s29  ;;  %s143_s7 = scalar_lea.vmem [#allocation4], %s304_s30 }
  0x17   : > { %s150_s8 = sshll.u32 %s143_s7, 4  ;;  %p552_p13 = pnand %p325_p10, %p524_p5  ;;  %s556_s8 = int_to_ptr.vmem [resolvable:$true] %s150_s8 }
  0x18   : > { %s140_s10 = scalar_lea.sflag [#allocation5], %s139_s28  ;;  %s363_s11 = scalar_lea.hbm %s548_s6, 128 }
  0x19   : > { %p364_p2 = scmp.ne.s32.totalorder %s548_s6, %s363_s11  ;;  %p365_p3 = pneg %p552_p13 }
  0x1a   : > { %s368_s14 = scalar_lea.hbm %s632_s2, 256  ;;  %p369_p5 = scmp.lt.s32.totalorder %s548_s6, %s632_s2 }
  0x1b   : > { %p366_p4 = pnand %p365_p3, %p364_p2  ;;  %p370_p8 = scmp.lt.s32.totalorder %s368_s14, %s363_s11 }
  0x1d   : > { %p367_p7 = pneg %p366_p4  ;;  %p371_p10 = por %p370_p8, %p369_p5 }
  0x1f   : > { %p372_p9 = pnand %p371_p10, %p367_p7 }
  0x21   : > { %375 = shalt.err (!%p372_p9)
}
  0x22   : > { %s376_s21 = scalar_lea.vmem %s556_s8, 128  ;;  %s457_s22 = smov [#allocation4]  }
  0x23   : > { %p377_p0 = scmp.ne.s32.totalorder %s556_s8, %s376_s21  ;;  %s381_s24 = sshll.u32 %s457_s22, 4  ;;  %s382_s24 = int_to_ptr.vmem [resolvable:$false] %s381_s24 }
  0x24   : > { %s383_s28 = scalar_lea.vmem %s382_s24, 256  ;;  %p384_p4 = scmp.lt.s32.totalorder %s556_s8, %s382_s24 }
  0x25   : > { %p379_p1 = pnand %p377_p0, %p365_p3  ;;  %p385_p12 = scmp.lt.s32.totalorder %s383_s28, %s376_s21 }
  0x27   : > { %p380_p2 = pneg %p379_p1  ;;  %p386_p11 = por %p385_p12, %p384_p4 }
  0x29   : > { %p387_p6 = pnand %p386_p11, %p380_p2 }
  0x2b   : > { %390 = shalt.err (!%p387_p6)
}
  0x2c   : > { %320 = dma.hbm_to_vmem [thread:$0]  (!%p552_p13), %s548_s6, 128, %s556_s8, %s140_s10  }
  0x2d   : > { %p641_p9 = scmp.lt.s32.totalorder %s455_s19, 3  ;;  %p642_p7 = scmp.ge.s32.totalorder %s455_s19, 1 }
  0x2f   : > { %p156_p0 = pnand %p642_p7, %p641_p9 }
  0x30   : > { %s583_s29 = sand.u32 (!%p156_p0), 1, %s447_s17   ;;  %p643_p6 = scmp.ne.s32.totalorder (!%p156_p0), %s637_s25, 0 }
  0x31   : > { %159 = sbr.rel (%p156_p0) target bundleno = 257 (0x101), region = 32  ;;  %s307_s30 = sshll.u32 (!%p156_p0), %s583_s29, 3 }
  0x32   : > { %s162_s4 = scalar_lea.sflag (!%p156_p0), [#allocation5], %s583_s29  ;;  %s165_s5 = scalar_lea.vmem (!%p156_p0), [#allocation4], %s307_s30 }
  0x36   : > { %434 = dma.done.wait (%p643_p6), %s162_s4, 128  }
  0x37   : > { %436 = vsyncadd (%p643_p6), %s162_s4, 4294967168  ;;  %v188_v0 = vld [vmem:[%s165_s5] sm:$0xff]  ;;  %s206_s25 = sld [smem:[#allocation2]]  ;;  %s310_s7 = sshll.u32 %s506_s0, 7 }
  0x38   : > { %189 = vadd.xlane.f32.xlu0 %v188_v0  ;;  %v191_v1 = vmul.f32 %v188_v0, %v188_v0  ;;  %s213_s6 = sld [smem:[#allocation3]]  ;;  %s187_s8 = scalar_lea.vmem [#allocation7], %s307_s30 }
  0x39   : > { %s231_s9 = sshll.u32 %s187_s8, 4  ;;  %s229_s12 = scalar_lea.hbm %s633_s3, %s310_s7  ;;  %s232_s9 = int_to_ptr.vmem [resolvable:$true] %s231_s9 }
  0x3a   : > { %s218_s13 = scalar_lea.sflag [#allocation6], %s583_s29  ;;  %s391_s14 = scalar_lea.vmem %s232_s9, 128 }
  0x3b   : > { %p392_p11 = scmp.ne.s32.totalorder %s232_s9, %s391_s14  ;;  %p644_p12 = scmp.ne.s32.totalorder %s638_s26, 0 }
  0x3c   : > { %192 = vadd.xlane.f32.xlu0 %v191_v1  ;;  %s458_s15 = smov [#allocation7]  }
  0x3d   : > { %v208_v15 = vstv %s206_s25  ;;  %p393_p13 = pnand %p392_p11, %p644_p12  ;;  %s395_s1 = sshll.u32 %s458_s15, 4  ;;  %s396_s1 = int_to_ptr.vmem [resolvable:$false] %s395_s1 }
  0x3e   : > { %v214_v19 = vstv %s213_s6  ;;  %s397_s0 = scalar_lea.vmem %s396_s1, 256  ;;  %p398_p3 = scmp.lt.s32.totalorder %s232_s9, %s396_s1 }
  0x3f   : > { %p394_p1 = pneg %p393_p13  ;;  %p399_p5 = scmp.lt.s32.totalorder %s397_s0, %s391_s14 }
  0x41   : > { %p400_p8 = por %p399_p5, %p398_p3 }
  0x43   : > { %p401_p10 = pnand %p400_p8, %p394_p1 }
  0xc1   : > { %v190_v2 = vpop.xlane.xlu0 %189 }
  0xc2   : > { %v194_v3 = vmul.f32 0.0078125, %v190_v2 }
  0xc4   : > { %v195_v4 = vmul.f32 %v194_v3, %v190_v2  ;;  %v211_v17 = vsub.f32 %v188_v0, %v194_v3 }
  0xc5   : > { %v193_v5 = vpop.xlane.xlu0 %192 }
  0xc6   : > { %v196_v6 = vsub.f32 %v193_v5, %v195_v4 }
  0xc8   : > { %v197_v7 = vmul.f32 0.007874016, %v196_v6 }
  0xca   : > { %v198_v8 = vmax.f32 %v197_v7, 0.0 }
  0xcc   : > { %359 = vrsqrt.f32 %v198_v8  ;;  %vm201_vm0 = vcmp.eq.f32.partialorder %v198_v8, inf  ;;  %v204_v11 = vand.u32 2147483648, %v198_v8  ;;  %vm203_vm1 = vcmp.eq.f32.partialorder %v198_v8, 0.0 }
  0xd9   : > { %v360_v9 = vpop.eup %359 }
  0xda   : > { %v200_v10 = vmul.f32 %v360_v9, %v198_v8 }
  0xdc   : > { %v202_v12 = vsel %vm201_vm0, %v198_v8, %v200_v10 }
  0xdd   : > { %v205_v13 = vsel %vm203_vm1, %v204_v11, %v202_v12 }
  0xde   : > { %v207_v14 = vadd.f32 1e-06, %v205_v13 }
  0xe0   : > { %361 = vrcp.f32 %v207_v14 }
  0xed   : > { %v362_v16 = vpop.eup %361 }
  0xee   : > { %v210_v18 = vmul.f32 %v362_v16, %v208_v15 }
  0xf0   : > { %v212_v20 = vmul.f32 %v211_v17, %v210_v18 }
  0xf2   : > { %v215_v21 = vadd.f32 %v214_v19, %v212_v20 }
  0xf4   : > { %216 = vst [vmem:[%s187_s8] sm:$0xff] %v215_v21 }
  0xf5   : > { %404 = shalt.err (!%p401_p10)
}
  0xf6   : > { %s405_s21 = scalar_lea.hbm %s229_s12, 128  ;;  %s409_s28 = scalar_lea.hbm %s633_s3, 256 }
  0xf7   : > { %p406_p2 = scmp.ne.s32.totalorder %s229_s12, %s405_s21  ;;  %p410_p7 = scmp.lt.s32.totalorder %s229_s12, %s633_s3 }
  0xf8   : > { %p411_p0 = scmp.lt.s32.totalorder %s409_s28, %s405_s21 }
  0xf9   : > { %p407_p4 = pnand %p406_p2, %p644_p12 }
  0xfa   : > { %p412_p6 = por %p411_p0, %p410_p7 }
  0xfb   : > { %p408_p9 = pneg %p407_p4 }
  0xfd   : > { %p413_p11 = pnand %p412_p6, %p408_p9 }
  0xff   : > { %416 = shalt.err (!%p413_p11)
}
 0x100   : > { %315 = dma.vmem_to_hbm [thread:$0]  (%p644_p12), %s232_s9, 128, %s229_s12, %s218_s13  }
 0x101 PF: > { %s243_s4 = sand.u32 1, %s443_s16   ;;  %p645_p13 = scmp.ne.s32.totalorder %s639_s27, 0 }
 0x102   : > { %p646_p1 = scmp.ge.s32.totalorder %s455_s19, 2  ;;  %s244_s5 = scalar_lea.sflag [#allocation6], %s243_s4 }
 0x104   : > { %p322_p3 = pnand %p646_p1, %p645_p13 }
 0x106   : > { %p323_p5 = pneg %p322_p3 }
 0x108   : > { %438 = dma.done.wait (%p323_p5), %s244_s5, 128  }
 0x109   : > { %440 = vsyncadd (%p323_p5), %s244_s5, 4294967168  ;;  %p18_p8 = scmp.ge.s32.totalorder %s510_s20, 4   ;;  %s647_s16 = smov %s447_s17 }
 0x10a   : > { %s648_s17 = smov %s451_s18  ;;  %s649_s18 = smov %s522_s23 }
 0x10b   : > { %s650_s19 = smov %s510_s20  ;;  %20 = sbr.rel (!%p18_p8) target bundleno = 8 (0x8), region = 77 }
 0x110   :  { %249 = vsyncpa [#allocation5], 1 }
 0x111   :  { %251 = vsyncpa [#allocation5 + $0x1], 1 }
 0x112   :  { %252 = vsyncpa [#allocation6], 1 }
 0x113   :  { %254 = vsyncpa [#allocation6 + $0x1], 1 }

</bundles_post_ra>
